<compile_context>
chip_gen: v7x
topology: tpu7x:2x2x1
jax: 0.10.0
libtpu: 0.0.40
codegen_flags: <defaults>
</compile_context>

<pallas_src>
import functools

import jax
import jax.numpy as jnp
from jax import lax
from jax.experimental import pallas as pl
from jax.experimental.pallas import tpu as pltpu

_LANE = 128
_SUBLANE = 8
_SUMSQ_MAX_TK = 8192                      # sum/sumsq per tile is safe up to this width
_DEFAULT_VMEM_CAP = 64 * 1024 * 1024      # conservative fallback (v7x per-TC VMEM)


# ---------------------------------------------------------------------------
# Budgets / small helpers
# ---------------------------------------------------------------------------
def _round_down(value, multiple):
    return max(multiple, (value // multiple) * multiple)


@functools.lru_cache(maxsize=None)
def _vmem_capacity_bytes():
    """Generation-aware VMEM capacity (128 MiB v5e/v6e, 64 MiB v7x)."""
    try:
        cap = int(getattr(pltpu.get_tpu_info(), "vmem_capacity_bytes", 0))
        if cap > 0:
            return cap
    except Exception:
        pass
    return _DEFAULT_VMEM_CAP


def _budgets(vmem_limit_bytes=None, block_budget_bytes=None):
    cap = _vmem_capacity_bytes()
    vmem_limit = int(vmem_limit_bytes) if vmem_limit_bytes else (cap * 3) // 4
    block_budget = (int(block_budget_bytes) if block_budget_bytes
                    else min(8 << 20, max(1 << 20, vmem_limit // 8)))
    return vmem_limit, block_budget


def _choose_subrows(B, K):
    """Sublane fill: split each sample row into r sub-rows so B*r fills 8 sublanes."""
    r = max(1, 8 // max(B, 1))
    while r > 1 and K % r != 0:
        r -= 1
    return r


def _pack_stats(c0, c1, c2, c3):
    """Pack four (rows, 1) columns into one (rows, 4) tile with a single store."""
    rows = c0.shape[0]
    col = lax.broadcasted_iota(jnp.int32, (rows, 4), 1)
    return (jnp.where(col == 0, c0, 0.0) + jnp.where(col == 1, c1, 0.0) +
            jnp.where(col == 2, c2, 0.0) + jnp.where(col == 3, c3, 0.0))


# ---------------------------------------------------------------------------
# Shared per-tile statistics (used by the stats kernel and the fused kernel)
# ---------------------------------------------------------------------------
def _tile_partials(x, *, TK, C, masked, centered):
    """Per-row [min, max, mean, M2] of one (rows, TK) f32 tile."""
    if masked:                                   # only ever the last, ragged tile
        rem = C % TK
        n_t = float(rem)
        col = lax.broadcasted_iota(jnp.int32, x.shape, 1)
        valid = col < rem
        x_min = jnp.where(valid, x, jnp.inf)
        x_max = jnp.where(valid, x, -jnp.inf)
        x_val = jnp.where(valid, x, 0.0)
    else:
        n_t = float(TK)
        valid = None
        x_min = x_max = x_val = x
    t_min = jnp.min(x_min, axis=1, keepdims=True)
    t_max = jnp.max(x_max, axis=1, keepdims=True)
    t_sum = jnp.sum(x_val, axis=1, keepdims=True)
    t_mean = t_sum * (1.0 / n_t)
    if centered:                                 # wide tiles: numerically safer
        c = x_val - t_mean
        if valid is not None:
            c = jnp.where(valid, c, 0.0)
        t_m2 = jnp.sum(c * c, axis=1, keepdims=True)
    else:                                        # narrow tiles: 2 fewer VPU ops/elem
        t_ssq = jnp.sum(x_val * x_val, axis=1, keepdims=True)
        t_m2 = jnp.maximum(t_ssq - t_sum * t_mean, 0.0)
    return t_min, t_max, t_mean, t_m2, n_t


def _combine_into(acc_ref, k, TK, partials):
    """Chan parallel-combine of one tile's partials into the resident accumulator."""
    t_min, t_max, t_mean, t_m2, n_t = partials

    @pl.when(k == 0)
    def _():
        acc_ref[...] = _pack_stats(t_min, t_max, t_mean, t_m2)

    @pl.when(k > 0)
    def _():
        prev = acc_ref[...]
        p_min, p_max = prev[:, 0:1], prev[:, 1:2]
        p_mean, p_m2 = prev[:, 2:3], prev[:, 3:4]
        n_a = (k * TK).astype(jnp.float32)       # all previous tiles are full
        n_tot = n_a + n_t
        delta = t_mean - p_mean
        new_mean = p_mean + delta * (n_t / n_tot)
        new_m2 = p_m2 + t_m2 + (delta * delta) * (n_a * (n_t / n_tot))
        acc_ref[...] = _pack_stats(jnp.minimum(p_min, t_min),
                                   jnp.maximum(p_max, t_max),
                                   new_mean, new_m2)


def _accumulate_tile(x, acc_ref, k, nk, *, TK, C, centered):
    """Full tiles take the unmasked reductions; only the last ragged tile is masked."""
    rem = C % TK
    if rem == 0:
        _combine_into(acc_ref, k, TK,
                      _tile_partials(x, TK=TK, C=C, masked=False, centered=centered))
    else:
        @pl.when(k < nk - 1)
        def _():
            _combine_into(acc_ref, k, TK,
                          _tile_partials(x, TK=TK, C=C, masked=False, centered=centered))

        @pl.when(k == nk - 1)
        def _():
            _combine_into(acc_ref, k, TK,
                          _tile_partials(x, TK=TK, C=C, masked=True, centered=centered))


# ---------------------------------------------------------------------------
# Kernel 1: two-pass path, per-row statistics (rows "parallel", K "arbitrary")
# ---------------------------------------------------------------------------
def _stats_kernel(x_ref, stats_ref, *, C, TK, centered):
    k = pl.program_id(1)
    nk = pl.num_programs(1)
    x = x_ref[...].astype(jnp.float32)
    _accumulate_tile(x, stats_ref, k, nk, TK=TK, C=C, centered=centered)


def _plan_stats(R, C, elem_bytes, budget):
    tb = R if R <= 256 else 256
    tb_pad = tb if tb % _SUBLANE == 0 else ((tb + _SUBLANE - 1) // _SUBLANE) * _SUBLANE
    if C <= _LANE or C * tb_pad * elem_bytes <= budget:
        tk = C
    else:
        tk = _round_down(budget // (tb_pad * elem_bytes), _LANE)
        tk = min(tk, (C // _LANE) * _LANE)
    return tb, tk


def _per_sample_stats(x2d, block_budget, vmem_limit):
    R, C = x2d.shape
    tb, tk = _plan_stats(R, C, x2d.dtype.itemsize, block_budget)
    centered = tk > _SUMSQ_MAX_TK
    return pl.pallas_call(
        functools.partial(_stats_kernel, C=C, TK=tk, centered=centered),
        out_shape=jax.ShapeDtypeStruct((R, 4), jnp.float32),
        grid=(pl.cdiv(R, tb), pl.cdiv(C, tk)),
        in_specs=[pl.BlockSpec((tb, tk), lambda i, k: (i, k))],
        out_specs=pl.BlockSpec((tb, 4), lambda i, k: (i, 0)),
        compiler_params=pltpu.CompilerParams(
            dimension_semantics=("parallel", "arbitrary"),
            vmem_limit_bytes=vmem_limit),
    )(x2d)


# ---------------------------------------------------------------------------
# Kernel 2: two-pass path, tiled element-wise quantize/dequantize
# ---------------------------------------------------------------------------
def _quant_kernel(params_ref, x_ref, o_ref):
    inv_scale = params_ref[0]
    scale = params_ref[1]
    zp = params_ref[2]
    qmax = params_ref[3]
    x = x_ref[...].astype(jnp.float32)
    y = jnp.round(jnp.clip(x * inv_scale + zp, 0.0, qmax))
    o_ref[...] = ((y - zp) * scale).astype(o_ref.dtype)


def _choose_quant_tiles(R, C, elem_bytes, budget, max_lanes=4096):
    if R * C * elem_bytes <= budget:
        return R, C
    if C <= _LANE:
        tk = C
    else:
        tk = min(_round_down(C, _LANE), max_lanes,
                 _round_down(budget // (_SUBLANE * elem_bytes), _LANE))
        if tk >= C:
            tk = C
    rows_fit = max(1, budget // (tk * elem_bytes))
    tb = R if R <= rows_fit else _round_down(rows_fit, _SUBLANE)
    return tb, tk


def _quantize_dequantize(x2d, inv_scale, scale, zero_point, qmax,
                         block_budget, vmem_limit):
    R, C = x2d.shape
    tb, tk = _choose_quant_tiles(R, C, x2d.dtype.itemsize, block_budget)
    params = jnp.stack([inv_scale, scale, zero_point,
                        jnp.float32(qmax)]).astype(jnp.float32)
    return pl.pallas_call(
        _quant_kernel,
        out_shape=jax.ShapeDtypeStruct((R, C), x2d.dtype),
        grid=(pl.cdiv(R, tb), pl.cdiv(C, tk)),
        in_specs=[pl.BlockSpec(memory_space=pltpu.SMEM),
                  pl.BlockSpec((tb, tk), lambda i, j: (i, j))],
        out_specs=pl.BlockSpec((tb, tk), lambda i, j: (i, j)),
        compiler_params=pltpu.CompilerParams(
            dimension_semantics=("parallel", "parallel"),
            vmem_limit_bytes=vmem_limit),
    )(params, x2d)


# ---------------------------------------------------------------------------
# Kernel 3: pipelined fused stats + quantize (single HBM read of x)
#   grid = (2, nk): phase 0 accumulates stats + fills a VMEM-resident copy,
#   phase 1 derives scale/zero_point in-kernel and quantizes from VMEM.
# ---------------------------------------------------------------------------
def _fused_kernel(x_ref, o_ref, gstats_ref, *scratch,
                  C, TK, B, r, num_bits, centered, has_copy):
    if has_copy:
        xcopy_ref, rstats_ref, qp_ref = scratch
    else:
        rstats_ref, qp_ref = scratch
    phase = pl.program_id(0)
    k = pl.program_id(1)
    nk = pl.num_programs(1)
    qmax = float(2.0 ** num_bits - 1.0)

    @pl.when(phase == 0)
    def _stats_phase():
        x_raw = x_ref[...]
        if has_copy:
            xcopy_ref[k] = x_raw                 # keep the tile resident in VMEM
        x = x_raw.astype(jnp.float32)
        _accumulate_tile(x, rstats_ref, k, nk, TK=TK, C=C, centered=centered)

        @pl.when(k == nk - 1)
        def _finalize():
            st = rstats_ref[...]                 # (rows, 4)
            s_min, s_max = st[:, 0:1], st[:, 1:2]
            s_mean, s_m2 = st[:, 2:3], st[:, 3:4]
            if r == 1:
                min_value = jnp.mean(s_min, axis=0, keepdims=True)
                max_value = jnp.mean(s_max, axis=0, keepdims=True)
            else:                                # sublane-filled: B <= 4 samples
                mins = [jnp.min(s_min[b * r:(b + 1) * r], axis=0, keepdims=True)
                        for b in range(B)]
                maxs = [jnp.max(s_max[b * r:(b + 1) * r], axis=0, keepdims=True)
                        for b in range(B)]
                min_value = sum(mins[1:], mins[0]) * (1.0 / B)
                max_value = sum(maxs[1:], maxs[0]) * (1.0 / B)
            gmean = jnp.mean(s_mean, axis=0, keepdims=True)
            d = s_mean - gmean
            gm2 = (jnp.sum(s_m2, axis=0, keepdims=True) +
                   float(C) * jnp.sum(d * d, axis=0, keepdims=True))
            gstats_ref[...] = _pack_stats(min_value, max_value, gmean, gm2)

            scale = jnp.maximum((max_value - min_value) / qmax, 1e-8)
            zp = jnp.floor(jnp.clip(-min_value / scale, 0.0, qmax))
            inv_scale = 1.0 / scale
            qp_ref[...] = _pack_stats(inv_scale, scale, zp, jnp.zeros_like(zp))

    @pl.when(phase == 1)
    def _quant_phase():
        qp = qp_ref[...]
        inv_scale = qp[0:1, 0:1]
        scale = qp[0:1, 1:2]
        zp = qp[0:1, 2:3]
        if has_copy:
            x = xcopy_ref[k].astype(jnp.float32)
        else:                                    # nk == 1: input block is still resident
            x = x_ref[...].astype(jnp.float32)
        y = jnp.round(jnp.clip(x * inv_scale + zp, 0.0, qmax))
        o_ref[...] = ((y - zp) * scale).astype(o_ref.dtype)


def _plan_fused(rows, C, elem_bytes, vmem_limit, block_budget):
    rows_pad = max(_SUBLANE, ((rows + _SUBLANE - 1) // _SUBLANE) * _SUBLANE)
    if C <= _LANE or C * rows_pad * elem_bytes <= block_budget:
        tk = C
    else:
        tk = _round_down(block_budget // (rows_pad * elem_bytes), _LANE)
        tk = min(tk, (C // _LANE) * _LANE)
    nk = -(-C // tk)
    copy_bytes = nk * rows_pad * tk * elem_bytes if nk > 1 else 0
    blk_native = rows_pad * tk * elem_bytes
    blk_f32 = rows_pad * tk * 4
    need = copy_bytes + 4 * blk_native + 6 * blk_f32 + (1 << 16)
    return need <= int(vmem_limit * 0.85), tk


def _fused_stats_quant(x2d, B, r, num_bits, tk, vmem_limit):
    rows, C = x2d.shape
    nk = -(-C // tk)
    has_copy = nk > 1
    centered = tk > _SUMSQ_MAX_TK
    scratch = []
    if has_copy:
        scratch.append(pltpu.VMEM((nk, rows, tk), x2d.dtype))
    scratch += [pltpu.VMEM((rows, 4), jnp.float32),   # per-row [min,max,mean,M2]
                pltpu.VMEM((1, 4), jnp.float32)]      # [inv_scale, scale, zp, -]
    kern = functools.partial(_fused_kernel, C=C, TK=tk, B=B, r=r,
                             num_bits=num_bits, centered=centered, has_copy=has_copy)
    out2d, gstats = pl.pallas_call(
        kern,
        out_shape=(jax.ShapeDtypeStruct((rows, C), x2d.dtype),
                   jax.ShapeDtypeStruct((1, 4), jnp.float32)),
        grid=(2, nk),
        # phase 0 walks the tiles; phase 1 pins the input index so no re-fetch happens.
        in_specs=[pl.BlockSpec((rows, tk),
                               lambda p, k: (0, (1 - p) * k + p * (nk - 1)))],
        out_specs=(pl.BlockSpec((rows, tk), lambda p, k: (0, p * k)),
                   pl.BlockSpec((1, 4), lambda p, k: (0, 0))),
        scratch_shapes=scratch,
        compiler_params=pltpu.CompilerParams(
            dimension_semantics=("arbitrary", "arbitrary"),
            vmem_limit_bytes=vmem_limit),
    )(x2d)
    return out2d, gstats


# ---------------------------------------------------------------------------
# QuantMeasure.forward (method='avg')
# ---------------------------------------------------------------------------
def quant_measure_forward(x, state, num_bits=8, momentum=None, training=True,
                          enable_quant=True, allow_fused=True,
                          vmem_limit_bytes=None, block_budget_bytes=None):
    """Returns (quantized_output, new_buffer_state)."""
    # TODO(synk): method='aciq' range clipping, the stochastic-noise path and the
    # out_half option of UniformQuantize (all off by default) are not implemented.
    vmem_limit, block_budget = _budgets(vmem_limit_bytes, block_budget_bytes)

    B = x.shape[0]
    total = int(x.size)
    K = total // B
    r = _choose_subrows(B, K)                 # sublane fill for small batches
    rows, cols = B * r, K // r
    x2d = x.reshape(rows, cols)               # no dtype cast: kernels upcast in-vreg

    new_state = dict(state)
    out2d = None

    if training:
        fuse_ok, fuse_tk = (False, 0)
        if enable_quant and allow_fused:
            fuse_ok, fuse_tk = _plan_fused(rows, cols, x2d.dtype.itemsize,
                                           vmem_limit, block_budget)
        if fuse_ok:
            out2d, gstats = _fused_stats_quant(x2d, B, r, num_bits, fuse_tk, vmem_limit)
            min_value, max_value = gstats[0, 0], gstats[0, 1]
            mean, m2 = gstats[0, 2], gstats[0, 3]
        else:
            stats = _per_sample_stats(x2d, block_budget, vmem_limit)
            s_min, s_max = stats[:, 0], stats[:, 1]
            s_mean, s_m2 = stats[:, 2], stats[:, 3]
            if r > 1:
                min_value = jnp.mean(jnp.min(s_min.reshape(B, r), axis=1))
                max_value = jnp.mean(jnp.max(s_max.reshape(B, r), axis=1))
            else:
                min_value = jnp.mean(s_min)   # input.view(B,-1).min(-1)[0].mean()
                max_value = jnp.mean(s_max)
            mean = jnp.mean(s_mean)           # equal per-row counts -> global mean
            m2 = jnp.sum(s_m2) + jnp.float32(cols) * jnp.sum((s_mean - mean) ** 2)

        var = m2 / jnp.float32(total - 1)     # unbiased, like torch.std(unbiased=True)
        std = jnp.sqrt(jnp.maximum(var, 0.0))

        nm = state["num_measurements"][0]
        mom = momentum if momentum is not None else nm / (nm + 1.0)

        def upd(run, new):
            return run * mom + new * (1.0 - mom)

        new_state["running_min"] = upd(state["running_min"], min_value)
        new_state["running_max"] = upd(state["running_max"], max_value)
        new_state["running_mean"] = upd(state["running_mean"], mean)
        new_state["running_var"] = upd(state["running_var"], std)
        new_state["num_measurements"] = state["num_measurements"] + 1.0
    else:
        min_value = state["running_min"][0]
        max_value = state["running_max"][0]

    if not enable_quant:
        return x, new_state

    if out2d is None:
        qmax = 2.0 ** num_bits - 1.0
        scale = jnp.maximum((max_value - min_value) / qmax, 1e-8)
        zero_point = jnp.floor(jnp.clip(-min_value / scale, 0.0, qmax))
        inv_scale = 1.0 / scale
        out2d = _quantize_dequantize(x2d, inv_scale, scale, zero_point, qmax,
                                     block_budget, vmem_limit)

    return out2d.reshape(x.shape), new_state


# ---------------------------------------------------------------------------
# Pure-JAX references (mirror the PyTorch module) for self-checking
# ---------------------------------------------------------------------------
def _reference_quantize(x, min_value, max_value, num_bits=8):
    qmax = 2.0 ** num_bits - 1.0
    scale = jnp.maximum((max_value - min_value) / qmax, 1e-8)
    zp = jnp.floor(jnp.clip(-min_value / scale, 0.0, qmax))
    y = jnp.round(jnp.clip(x * (1.0 / scale) + zp, 0.0, qmax))
    return ((y - zp) * scale).astype(x.dtype)


def _reference_forward(x, state, num_bits=8, momentum=None):
    B = x.shape[0]
    x2d = x.reshape(B, -1).astype(jnp.float32)
    mn = x2d.min(axis=1).mean()
    mx = x2d.max(axis=1).mean()
    mean = x2d.mean()
    std = jnp.std(x2d, ddof=1)
    nm = state["num_measurements"][0]
    mom = momentum if momentum is not None else nm / (nm + 1.0)
    upd = lambda run, new: run * mom + new * (1.0 - mom)
    new_state = dict(
        state,
        running_min=upd(state["running_min"], mn),
        running_max=upd(state["running_max"], mx),
        running_mean=upd(state["running_mean"], mean),
        running_var=upd(state["running_var"], std),
        num_measurements=state["num_measurements"] + 1.0,
    )
    return _reference_quantize(x, mn, mx, num_bits), new_state


if __name__ == "__main__":
    root = jax.random.PRNGKey(0)
    keys = jax.random.split(root, 6)
    QMAX = 255.0

    def fresh_state():
        return dict(
            running_min=jnp.zeros((1,), jnp.float32),
            running_max=jnp.zeros((1,), jnp.float32),
            running_mean=jnp.zeros((1,), jnp.float32),
            running_var=jnp.ones((1,), jnp.float32),
            num_measurements=jnp.zeros((1,), jnp.float32),
        )

    def state_scale(st):
        return max(float((st["running_max"][0] - st["running_min"][0]) / QMAX), 1e-8)

    def assert_stats_close(name, st, rst):
        for kname in ("running_min", "running_max", "running_mean",
                      "running_var", "num_measurements"):
            assert jnp.allclose(st[kname], rst[kname], atol=2e-4, rtol=2e-4), (
                f"{name}:{kname} {st[kname]} vs {rst[kname]}")

    def assert_quant_close(name, out, ref, step):
        # Exact up to at most one quantization step on a handful of elements whose
        # pre-round value sits on a .5 boundary (ulp-level reduce/divide ordering).
        d = jnp.abs(out.astype(jnp.float32).reshape(-1) -
                    ref.astype(jnp.float32).reshape(-1))
        max_d = float(jnp.max(d))
        n_bad = int(jnp.sum(d > 1e-4))
        assert max_d <= step * 1.001 + 1e-6, f"{name}: max diff {max_d} > step {step}"
        assert n_bad <= max(3, d.size // 200), f"{name}: {n_bad} mismatched elements"

    # --- Case 1: small NCHW activation -> fused single-tile path (B=2, sublane fill r=4)
    x1 = jax.random.normal(keys[0], (2, 4, 16, 16), jnp.float32)
    out1, st1 = quant_measure_forward(x1, fresh_state(), num_bits=8, training=True)
    out1 = jax.block_until_ready(out1)
    ref1, rst1 = _reference_forward(x1, fresh_state(), num_bits=8)
    assert_stats_close("case1", st1, rst1)
    assert_quant_close("case1", out1, ref1, state_scale(st1))

    # --- Case 2: odd shape, forced two-pass path with tiny tiles (tail mask + edges)
    x2 = jax.random.normal(keys[1], (3, 5, 9, 11), jnp.float32)
    out2, st2 = quant_measure_forward(x2, fresh_state(), training=True,
                                      allow_fused=False, block_budget_bytes=2048)
    out2 = jax.block_until_ready(out2)
    ref2, rst2 = _reference_forward(x2, fresh_state())
    assert_stats_close("case2", st2, rst2)
    assert_quant_close("case2", out2, ref2, state_scale(st2))

    # --- Case 3: fused multi-tile path (VMEM-resident copy, ragged last tile)
    x3 = jax.random.normal(keys[2], (2, 3, 10, 20), jnp.float32)
    out3, st3 = quant_measure_forward(x3, fresh_state(), training=True,
                                      block_budget_bytes=4096)
    out3 = jax.block_until_ready(out3)
    ref3, rst3 = _reference_forward(x3, fresh_state())
    assert_stats_close("case3", st3, rst3)
    assert_quant_close("case3", out3, ref3, state_scale(st3))

    # --- Case 4: large batch on the two-pass path (row-tiled "parallel" stats grid)
    x4 = jax.random.normal(keys[3], (260, 33), jnp.float32)
    out4, st4 = quant_measure_forward(x4, fresh_state(), training=True,
                                      allow_fused=False, block_budget_bytes=8192)
    out4 = jax.block_until_ready(out4)
    ref4, rst4 = _reference_forward(x4, fresh_state())
    assert_stats_close("case4", st4, rst4)
    assert_quant_close("case4", out4, ref4, state_scale(st4))

    # --- Case 5: fused path without sublane fill (B=16 -> in-kernel mean over rows)
    x5 = jax.random.normal(keys[4], (16, 48), jnp.float32)
    out5, st5 = quant_measure_forward(x5, fresh_state(), training=True)
    out5 = jax.block_until_ready(out5)
    ref5, rst5 = _reference_forward(x5, fresh_state())
    assert_stats_close("case5", st5, rst5)
    assert_quant_close("case5", out5, ref5, state_scale(st5))

    # --- Case 6: eval mode, quantize with the running range measured in case 1
    out6, _ = quant_measure_forward(x1, st1, training=False)
    out6 = jax.block_until_ready(out6)
    ref6 = _reference_quantize(x1.astype(jnp.float32),
                               st1["running_min"][0], st1["running_max"][0])
    assert_quant_close("case6", out6, ref6, state_scale(st1))

    # --- Case 7: measurement only (enable_quant=False) -> stats kernel, passthrough
    out7, st7 = quant_measure_forward(x1, fresh_state(), training=True,
                                      enable_quant=False)
    out7 = jax.block_until_ready(out7)
    assert_stats_close("case7", st7, rst1)
    assert bool(jnp.all(out7 == x1))

    print("KERNEL_OK")
</pallas_src>

<mosaic_0001>
module attributes {stable_mosaic.version = 11 : i64} {
  func.func @_fused_kernel(%arg0: i32, %arg1: i32, %arg2: memref<8x256xf32, #tpu.memory_space<vmem>>, %arg3: memref<8x256xf32, #tpu.memory_space<vmem>>, %arg4: memref<1x4xf32, #tpu.memory_space<vmem>>, %arg5: memref<8x4xf32, #tpu.memory_space<vmem>>, %arg6: memref<1x4xf32, #tpu.memory_space<vmem>>) attributes {dimension_semantics = [#tpu.dimension_semantics<arbitrary>, #tpu.dimension_semantics<arbitrary>], iteration_bounds = array<i64: 2, 1>, scalar_prefetch = 0 : i64, scratch_operands = 2 : i64, tpu.core_type = #tpu.core_type<tc>, window_params = [{transform_indices = @transform_0, window_bounds = array<i64: 8, 256>}, {transform_indices = @transform_1, window_bounds = array<i64: 8, 256>}, {pipeline_mode = #tpu.pipeline_mode<synchronous>, transform_indices = @transform_2, window_bounds = array<i64: 1, 4>}]} {
    %c0_i32 = arith.constant 0 : i32
    %0 = arith.cmpi eq, %arg0, %c0_i32 : i32
    %1 = arith.extui %0 : i1 to i32
    %c0_i32_0 = arith.constant 0 : i32
    %2 = arith.cmpi ne, %1, %c0_i32_0 : i32
    scf.if %2 {
      %c0 = arith.constant 0 : index
      %c0_2 = arith.constant 0 : index
      %6 = vector.load %arg2[%c0, %c0_2] : memref<8x256xf32, #tpu.memory_space<vmem>>, vector<8x256xf32>
      %cst = arith.constant dense<0x7F800000> : vector<8xf32>
      %7 = vector.multi_reduction <minimumf>, %6, %cst [1] : vector<8x256xf32> to vector<8xf32>
      %8 = vector.shape_cast %7 : vector<8xf32> to vector<8x1xf32>
      %cst_3 = arith.constant dense<0xFF800000> : vector<8xf32>
      %9 = vector.multi_reduction <maximumf>, %6, %cst_3 [1] : vector<8x256xf32> to vector<8xf32>
      %10 = vector.shape_cast %9 : vector<8xf32> to vector<8x1xf32>
      %cst_4 = arith.constant dense<0.000000e+00> : vector<8xf32>
      %11 = vector.multi_reduction <add>, %6, %cst_4 [1] : vector<8x256xf32> to vector<8xf32>
      %12 = vector.shape_cast %11 : vector<8xf32> to vector<8x1xf32>
      %cst_5 = arith.constant 3.906250e-03 : f32
      %13 = vector.broadcast %cst_5 : f32 to vector<8x1xf32>
      %14 = arith.mulf %12, %13 : vector<8x1xf32>
      %15 = arith.mulf %6, %6 : vector<8x256xf32>
      %cst_6 = arith.constant dense<0.000000e+00> : vector<8xf32>
      %16 = vector.multi_reduction <add>, %15, %cst_6 [1] : vector<8x256xf32> to vector<8xf32>
      %17 = vector.shape_cast %16 : vector<8xf32> to vector<8x1xf32>
      %18 = arith.mulf %12, %14 : vector<8x1xf32>
      %19 = arith.subf %17, %18 : vector<8x1xf32>
      %cst_7 = arith.constant 0.000000e+00 : f32
      %20 = vector.broadcast %cst_7 : f32 to vector<8x1xf32>
      %21 = arith.maximumf %19, %20 : vector<8x1xf32>
      %c0_i32_8 = arith.constant 0 : i32
      %22 = arith.cmpi eq, %arg1, %c0_i32_8 : i32
      %23 = arith.extui %22 : i1 to i32
      %c0_i32_9 = arith.constant 0 : i32
      %24 = arith.cmpi ne, %23, %c0_i32_9 : i32
      scf.if %24 {
        %31 = tpu.iota {dimensions = array<i32: 1>} : vector<8x4xi32>
        %c0_i32_14 = arith.constant 0 : i32
        %32 = vector.broadcast %c0_i32_14 : i32 to vector<8x4xi32>
        %33 = arith.cmpi eq, %31, %32 : vector<8x4xi32>
        %cst_15 = arith.constant 0.000000e+00 : f32
        %34 = vector.shape_cast %8 : vector<8x1xf32> to vector<8x1xf32>
        %35 = vector.broadcast %34 : vector<8x1xf32> to vector<8x4xf32>
        %36 = vector.broadcast %cst_15 : f32 to vector<8x4xf32>
        %37 = arith.select %33, %35, %36 : vector<8x4xi1>, vector<8x4xf32>
        %c1_i32_16 = arith.constant 1 : i32
        %38 = vector.broadcast %c1_i32_16 : i32 to vector<8x4xi32>
        %39 = arith.cmpi eq, %31, %38 : vector<8x4xi32>
        %cst_17 = arith.constant 0.000000e+00 : f32
        %40 = vector.shape_cast %10 : vector<8x1xf32> to vector<8x1xf32>
        %41 = vector.broadcast %40 : vector<8x1xf32> to vector<8x4xf32>
        %42 = vector.broadcast %cst_17 : f32 to vector<8x4xf32>
        %43 = arith.select %39, %41, %42 : vector<8x4xi1>, vector<8x4xf32>
        %44 = arith.addf %37, %43 : vector<8x4xf32>
        %c2_i32 = arith.constant 2 : i32
        %45 = vector.broadcast %c2_i32 : i32 to vector<8x4xi32>
        %46 = arith.cmpi eq, %31, %45 : vector<8x4xi32>
        %cst_18 = arith.constant 0.000000e+00 : f32
        %47 = vector.shape_cast %14 : vector<8x1xf32> to vector<8x1xf32>
        %48 = vector.broadcast %47 : vector<8x1xf32> to vector<8x4xf32>
        %49 = vector.broadcast %cst_18 : f32 to vector<8x4xf32>
        %50 = arith.select %46, %48, %49 : vector<8x4xi1>, vector<8x4xf32>
        %51 = arith.addf %44, %50 : vector<8x4xf32>
        %c3_i32 = arith.constant 3 : i32
        %52 = vector.broadcast %c3_i32 : i32 to vector<8x4xi32>
        %53 = arith.cmpi eq, %31, %52 : vector<8x4xi32>
        %cst_19 = arith.constant 0.000000e+00 : f32
        %54 = vector.shape_cast %21 : vector<8x1xf32> to vector<8x1xf32>
        %55 = vector.broadcast %54 : vector<8x1xf32> to vector<8x4xf32>
        %56 = vector.broadcast %cst_19 : f32 to vector<8x4xf32>
        %57 = arith.select %53, %55, %56 : vector<8x4xi1>, vector<8x4xf32>
        %58 = arith.addf %51, %57 : vector<8x4xf32>
        %c0_20 = arith.constant 0 : index
        %c0_21 = arith.constant 0 : index
        %59 = vector.load %arg5[%c0_20, %c0_21] : memref<8x4xf32, #tpu.memory_space<vmem>>, vector<8x4xf32>
        tpu.vector_store %arg5[%c0_20, %c0_21], %58 {strides = array<i32>} : memref<8x4xf32, #tpu.memory_space<vmem>>, vector<8x4xf32>,
      } else {
      }
      %c0_i32_10 = arith.constant 0 : i32
      %25 = arith.cmpi sgt, %arg1, %c0_i32_10 : i32
      %26 = arith.extui %25 : i1 to i32
      %c0_i32_11 = arith.constant 0 : i32
      %27 = arith.cmpi ne, %26, %c0_i32_11 : i32
      scf.if %27 {
        %c0_14 = arith.constant 0 : index
        %c0_15 = arith.constant 0 : index
        %31 = vector.load %arg5[%c0_14, %c0_15] : memref<8x4xf32, #tpu.memory_space<vmem>>, vector<8x4xf32>
        %32 = vector.extract_strided_slice %31 {offsets = [0, 0], sizes = [8, 1], strides = [1, 1]} : vector<8x4xf32> to vector<8x1xf32>
        %33 = vector.extract_strided_slice %31 {offsets = [0, 1], sizes = [8, 1], strides = [1, 1]} : vector<8x4xf32> to vector<8x1xf32>
        %34 = vector.extract_strided_slice %31 {offsets = [0, 2], sizes = [8, 1], strides = [1, 1]} : vector<8x4xf32> to vector<8x1xf32>
        %35 = vector.extract_strided_slice %31 {offsets = [0, 3], sizes = [8, 1], strides = [1, 1]} : vector<8x4xf32> to vector<8x1xf32>
        %c256_i32 = arith.constant 256 : i32
        %36 = arith.muli %arg1, %c256_i32 : i32
        %37 = arith.sitofp %36 : i32 to f32
        %cst_16 = arith.constant 2.560000e+02 : f32
        %38 = arith.addf %37, %cst_16 : f32
        %39 = arith.subf %14, %34 : vector<8x1xf32>
        %cst_17 = arith.constant 2.560000e+02 : f32
        %40 = arith.divf %cst_17, %38 : f32
        %41 = vector.broadcast %40 : f32 to vector<8x1xf32>
        %42 = arith.mulf %39, %41 : vector<8x1xf32>
        %43 = arith.addf %34, %42 : vector<8x1xf32>
        %44 = arith.addf %35, %21 : vector<8x1xf32>
        %45 = arith.mulf %39, %39 : vector<8x1xf32>
        %cst_18 = arith.constant 2.560000e+02 : f32
        %46 = arith.divf %cst_18, %38 : f32
        %47 = arith.mulf %37, %46 : f32
        %48 = vector.broadcast %47 : f32 to vector<8x1xf32>
        %49 = arith.mulf %45, %48 : vector<8x1xf32>
        %50 = arith.addf %44, %49 : vector<8x1xf32>
        %51 = arith.minimumf %32, %8 : vector<8x1xf32>
        %52 = arith.maximumf %33, %10 : vector<8x1xf32>
        %53 = tpu.iota {dimensions = array<i32: 1>} : vector<8x4xi32>
        %c0_i32_19 = arith.constant 0 : i32
        %54 = vector.broadcast %c0_i32_19 : i32 to vector<8x4xi32>
        %55 = arith.cmpi eq, %53, %54 : vector<8x4xi32>
        %cst_20 = arith.constant 0.000000e+00 : f32
        %56 = vector.shape_cast %51 : vector<8x1xf32> to vector<8x1xf32>
        %57 = vector.broadcast %56 : vector<8x1xf32> to vector<8x4xf32>
        %58 = vector.broadcast %cst_20 : f32 to vector<8x4xf32>
        %59 = arith.select %55, %57, %58 : vector<8x4xi1>, vector<8x4xf32>
        %c1_i32_21 = arith.constant 1 : i32
        %60 = vector.broadcast %c1_i32_21 : i32 to vector<8x4xi32>
        %61 = arith.cmpi eq, %53, %60 : vector<8x4xi32>
        %cst_22 = arith.constant 0.000000e+00 : f32
        %62 = vector.shape_cast %52 : vector<8x1xf32> to vector<8x1xf32>
        %63 = vector.broadcast %62 : vector<8x1xf32> to vector<8x4xf32>
        %64 = vector.broadcast %cst_22 : f32 to vector<8x4xf32>
        %65 = arith.select %61, %63, %64 : vector<8x4xi1>, vector<8x4xf32>
        %66 = arith.addf %59, %65 : vector<8x4xf32>
        %c2_i32 = arith.constant 2 : i32
        %67 = vector.broadcast %c2_i32 : i32 to vector<8x4xi32>
        %68 = arith.cmpi eq, %53, %67 : vector<8x4xi32>
        %cst_23 = arith.constant 0.000000e+00 : f32
        %69 = vector.shape_cast %43 : vector<8x1xf32> to vector<8x1xf32>
        %70 = vector.broadcast %69 : vector<8x1xf32> to vector<8x4xf32>
        %71 = vector.broadcast %cst_23 : f32 to vector<8x4xf32>
        %72 = arith.select %68, %70, %71 : vector<8x4xi1>, vector<8x4xf32>
        %73 = arith.addf %66, %72 : vector<8x4xf32>
        %c3_i32 = arith.constant 3 : i32
        %74 = vector.broadcast %c3_i32 : i32 to vector<8x4xi32>
        %75 = arith.cmpi eq, %53, %74 : vector<8x4xi32>
        %cst_24 = arith.constant 0.000000e+00 : f32
        %76 = vector.shape_cast %50 : vector<8x1xf32> to vector<8x1xf32>
        %77 = vector.broadcast %76 : vector<8x1xf32> to vector<8x4xf32>
        %78 = vector.broadcast %cst_24 : f32 to vector<8x4xf32>
        %79 = arith.select %75, %77, %78 : vector<8x4xi1>, vector<8x4xf32>
        %80 = arith.addf %73, %79 : vector<8x4xf32>
        %c0_25 = arith.constant 0 : index
        %c0_26 = arith.constant 0 : index
        %81 = vector.load %arg5[%c0_25, %c0_26] : memref<8x4xf32, #tpu.memory_space<vmem>>, vector<8x4xf32>
        tpu.vector_store %arg5[%c0_25, %c0_26], %80 {strides = array<i32>} : memref<8x4xf32, #tpu.memory_space<vmem>>, vector<8x4xf32>,
      } else {
      }
      %c0_i32_12 = arith.constant 0 : i32
      %28 = arith.cmpi eq, %arg1, %c0_i32_12 : i32
      %29 = arith.extui %28 : i1 to i32
      %c0_i32_13 = arith.constant 0 : i32
      %30 = arith.cmpi ne, %29, %c0_i32_13 : i32
      scf.if %30 {
        %c0_14 = arith.constant 0 : index
        %c0_15 = arith.constant 0 : index
        %31 = vector.load %arg5[%c0_14, %c0_15] : memref<8x4xf32, #tpu.memory_space<vmem>>, vector<8x4xf32>
        %32 = vector.extract_strided_slice %31 {offsets = [0, 0], sizes = [8, 1], strides = [1, 1]} : vector<8x4xf32> to vector<8x1xf32>
        %33 = vector.extract_strided_slice %31 {offsets = [0, 1], sizes = [8, 1], strides = [1, 1]} : vector<8x4xf32> to vector<8x1xf32>
        %34 = vector.extract_strided_slice %31 {offsets = [0, 2], sizes = [8, 1], strides = [1, 1]} : vector<8x4xf32> to vector<8x1xf32>
        %35 = vector.extract_strided_slice %31 {offsets = [0, 3], sizes = [8, 1], strides = [1, 1]} : vector<8x4xf32> to vector<8x1xf32>
        %36 = vector.extract_strided_slice %32 {offsets = [0, 0], sizes = [4, 1], strides = [1, 1]} : vector<8x1xf32> to vector<4x1xf32>
        %cst_16 = arith.constant dense<0x7F800000> : vector<1xf32>
        %37 = vector.multi_reduction <minimumf>, %36, %cst_16 [0] : vector<4x1xf32> to vector<1xf32>
        %38 = vector.shape_cast %37 : vector<1xf32> to vector<1x1xf32>
        %39 = vector.extract_strided_slice %32 {offsets = [4, 0], sizes = [4, 1], strides = [1, 1]} : vector<8x1xf32> to vector<4x1xf32>
        %cst_17 = arith.constant dense<0x7F800000> : vector<1xf32>
        %40 = vector.multi_reduction <minimumf>, %39, %cst_17 [0] : vector<4x1xf32> to vector<1xf32>
        %41 = vector.shape_cast %40 : vector<1xf32> to vector<1x1xf32>
        %42 = vector.extract_strided_slice %33 {offsets = [0, 0], sizes = [4, 1], strides = [1, 1]} : vector<8x1xf32> to vector<4x1xf32>
        %cst_18 = arith.constant dense<0xFF800000> : vector<1xf32>
        %43 = vector.multi_reduction <maximumf>, %42, %cst_18 [0] : vector<4x1xf32> to vector<1xf32>
        %44 = vector.shape_cast %43 : vector<1xf32> to vector<1x1xf32>
        %45 = vector.extract_strided_slice %33 {offsets = [4, 0], sizes = [4, 1], strides = [1, 1]} : vector<8x1xf32> to vector<4x1xf32>
        %cst_19 = arith.constant dense<0xFF800000> : vector<1xf32>
        %46 = vector.multi_reduction <maximumf>, %45, %cst_19 [0] : vector<4x1xf32> to vector<1xf32>
        %47 = vector.shape_cast %46 : vector<1xf32> to vector<1x1xf32>
        %48 = arith.addf %38, %41 : vector<1x1xf32>
        %cst_20 = arith.constant 5.000000e-01 : f32
        %49 = vector.broadcast %cst_20 : f32 to vector<1x1xf32>
        %50 = arith.mulf %48, %49 : vector<1x1xf32>
        %51 = arith.addf %44, %47 : vector<1x1xf32>
        %cst_21 = arith.constant 5.000000e-01 : f32
        %52 = vector.broadcast %cst_21 : f32 to vector<1x1xf32>
        %53 = arith.mulf %51, %52 : vector<1x1xf32>
        %cst_22 = arith.constant dense<0.000000e+00> : vector<1xf32>
        %54 = vector.multi_reduction <add>, %34, %cst_22 [0] : vector<8x1xf32> to vector<1xf32>
        %55 = vector.shape_cast %54 : vector<1xf32> to vector<1x1xf32>
        %cst_23 = arith.constant 8.000000e+00 : f32
        %56 = vector.broadcast %cst_23 : f32 to vector<1x1xf32>
        %57 = arith.divf %55, %56 : vector<1x1xf32>
        %58 = vector.broadcast %57 : vector<1x1xf32> to vector<8x1xf32>
        %59 = arith.subf %34, %58 : vector<8x1xf32>
        %cst_24 = arith.constant dense<0.000000e+00> : vector<1xf32>
        %60 = vector.multi_reduction <add>, %35, %cst_24 [0] : vector<8x1xf32> to vector<1xf32>
        %61 = vector.shape_cast %60 : vector<1xf32> to vector<1x1xf32>
        %62 = arith.mulf %59, %59 : vector<8x1xf32>
        %cst_25 = arith.constant dense<0.000000e+00> : vector<1xf32>
        %63 = vector.multi_reduction <add>, %62, %cst_25 [0] : vector<8x1xf32> to vector<1xf32>
        %64 = vector.shape_cast %63 : vector<1xf32> to vector<1x1xf32>
        %cst_26 = arith.constant 2.560000e+02 : f32
        %65 = vector.broadcast %cst_26 : f32 to vector<1x1xf32>
        %66 = arith.mulf %65, %64 : vector<1x1xf32>
        %67 = arith.addf %61, %66 : vector<1x1xf32>
        %68 = tpu.iota {dimensions = array<i32: 1>} : vector<1x4xi32>
        %c0_i32_27 = arith.constant 0 : i32
        %69 = vector.broadcast %c0_i32_27 : i32 to vector<1x4xi32>
        %70 = arith.cmpi eq, %68, %69 : vector<1x4xi32>
        %cst_28 = arith.constant 0.000000e+00 : f32
        %71 = vector.shape_cast %50 : vector<1x1xf32> to vector<1x1xf32>
        %72 = vector.broadcast %71 : vector<1x1xf32> to vector<1x4xf32>
        %73 = vector.broadcast %cst_28 : f32 to vector<1x4xf32>
        %74 = arith.select %70, %72, %73 : vector<1x4xi1>, vector<1x4xf32>
        %c1_i32_29 = arith.constant 1 : i32
        %75 = vector.broadcast %c1_i32_29 : i32 to vector<1x4xi32>
        %76 = arith.cmpi eq, %68, %75 : vector<1x4xi32>
        %cst_30 = arith.constant 0.000000e+00 : f32
        %77 = vector.shape_cast %53 : vector<1x1xf32> to vector<1x1xf32>
        %78 = vector.broadcast %77 : vector<1x1xf32> to vector<1x4xf32>
        %79 = vector.broadcast %cst_30 : f32 to vector<1x4xf32>
        %80 = arith.select %76, %78, %79 : vector<1x4xi1>, vector<1x4xf32>
        %81 = arith.addf %74, %80 : vector<1x4xf32>
        %c2_i32 = arith.constant 2 : i32
        %82 = vector.broadcast %c2_i32 : i32 to vector<1x4xi32>
        %83 = arith.cmpi eq, %68, %82 : vector<1x4xi32>
        %cst_31 = arith.constant 0.000000e+00 : f32
        %84 = vector.shape_cast %57 : vector<1x1xf32> to vector<1x1xf32>
        %85 = vector.broadcast %84 : vector<1x1xf32> to vector<1x4xf32>
        %86 = vector.broadcast %cst_31 : f32 to vector<1x4xf32>
        %87 = arith.select %83, %85, %86 : vector<1x4xi1>, vector<1x4xf32>
        %88 = arith.addf %81, %87 : vector<1x4xf32>
        %c3_i32 = arith.constant 3 : i32
        %89 = vector.broadcast %c3_i32 : i32 to vector<1x4xi32>
        %90 = arith.cmpi eq, %68, %89 : vector<1x4xi32>
        %cst_32 = arith.constant 0.000000e+00 : f32
        %91 = vector.shape_cast %67 : vector<1x1xf32> to vector<1x1xf32>
        %92 = vector.broadcast %91 : vector<1x1xf32> to vector<1x4xf32>
        %93 = vector.broadcast %cst_32 : f32 to vector<1x4xf32>
        %94 = arith.select %90, %92, %93 : vector<1x4xi1>, vector<1x4xf32>
        %95 = arith.addf %88, %94 : vector<1x4xf32>
        %c0_33 = arith.constant 0 : index
        %c0_34 = arith.constant 0 : index
        %96 = vector.load %arg4[%c0_33, %c0_34] : memref<1x4xf32, #tpu.memory_space<vmem>>, vector<1x4xf32>
        tpu.vector_store %arg4[%c0_33, %c0_34], %95 {strides = array<i32>} : memref<1x4xf32, #tpu.memory_space<vmem>>, vector<1x4xf32>,
        %97 = arith.subf %53, %50 : vector<1x1xf32>
        %cst_35 = arith.constant 2.550000e+02 : f32
        %98 = vector.broadcast %cst_35 : f32 to vector<1x1xf32>
        %99 = arith.divf %97, %98 : vector<1x1xf32>
        %cst_36 = arith.constant 9.99999993E-9 : f32
        %100 = vector.broadcast %cst_36 : f32 to vector<1x1xf32>
        %101 = arith.maximumf %99, %100 : vector<1x1xf32>
        %cst_37 = arith.constant 0.000000e+00 : f32
        %102 = vector.broadcast %cst_37 : f32 to vector<1x1xf32>
        %103 = arith.subf %102, %50 : vector<1x1xf32>
        %104 = arith.divf %103, %101 : vector<1x1xf32>
        %cst_38 = arith.constant 0.000000e+00 : f32
        %cst_39 = arith.constant 2.550000e+02 : f32
        %105 = vector.broadcast %cst_38 : f32 to vector<1x1xf32>
        %106 = arith.maximumf %105, %104 : vector<1x1xf32>
        %107 = vector.broadcast %cst_39 : f32 to vector<1x1xf32>
        %108 = arith.minimumf %107, %106 : vector<1x1xf32>
        %109 = math.floor %108 : vector<1x1xf32>
        %cst_40 = arith.constant 1.000000e+00 : f32
        %110 = vector.broadcast %cst_40 : f32 to vector<1x1xf32>
        %111 = arith.divf %110, %101 : vector<1x1xf32>
        %cst_41 = arith.constant 0.000000e+00 : f32
        %112 = vector.broadcast %cst_41 : f32 to vector<1x1xf32>
        %113 = tpu.iota {dimensions = array<i32: 1>} : vector<1x4xi32>
        %c0_i32_42 = arith.constant 0 : i32
        %114 = vector.broadcast %c0_i32_42 : i32 to vector<1x4xi32>
        %115 = arith.cmpi eq, %113, %114 : vector<1x4xi32>
        %cst_43 = arith.constant 0.000000e+00 : f32
        %116 = vector.shape_cast %111 : vector<1x1xf32> to vector<1x1xf32>
        %117 = vector.broadcast %116 : vector<1x1xf32> to vector<1x4xf32>
        %118 = vector.broadcast %cst_43 : f32 to vector<1x4xf32>
        %119 = arith.select %115, %117, %118 : vector<1x4xi1>, vector<1x4xf32>
        %c1_i32_44 = arith.constant 1 : i32
        %120 = vector.broadcast %c1_i32_44 : i32 to vector<1x4xi32>
        %121 = arith.cmpi eq, %113, %120 : vector<1x4xi32>
        %cst_45 = arith.constant 0.000000e+00 : f32
        %122 = vector.shape_cast %101 : vector<1x1xf32> to vector<1x1xf32>
        %123 = vector.broadcast %122 : vector<1x1xf32> to vector<1x4xf32>
        %124 = vector.broadcast %cst_45 : f32 to vector<1x4xf32>
        %125 = arith.select %121, %123, %124 : vector<1x4xi1>, vector<1x4xf32>
        %126 = arith.addf %119, %125 : vector<1x4xf32>
        %c2_i32_46 = arith.constant 2 : i32
        %127 = vector.broadcast %c2_i32_46 : i32 to vector<1x4xi32>
        %128 = arith.cmpi eq, %113, %127 : vector<1x4xi32>
        %cst_47 = arith.constant 0.000000e+00 : f32
        %129 = vector.shape_cast %109 : vector<1x1xf32> to vector<1x1xf32>
        %130 = vector.broadcast %129 : vector<1x1xf32> to vector<1x4xf32>
        %131 = vector.broadcast %cst_47 : f32 to vector<1x4xf32>
        %132 = arith.select %128, %130, %131 : vector<1x4xi1>, vector<1x4xf32>
        %133 = arith.addf %126, %132 : vector<1x4xf32>
        %c3_i32_48 = arith.constant 3 : i32
        %134 = vector.broadcast %c3_i32_48 : i32 to vector<1x4xi32>
        %135 = arith.cmpi eq, %113, %134 : vector<1x4xi32>
        %cst_49 = arith.constant 0.000000e+00 : f32
        %136 = vector.shape_cast %112 : vector<1x1xf32> to vector<1x1xf32>
        %137 = vector.broadcast %136 : vector<1x1xf32> to vector<1x4xf32>
        %138 = vector.broadcast %cst_49 : f32 to vector<1x4xf32>
        %139 = arith.select %135, %137, %138 : vector<1x4xi1>, vector<1x4xf32>
        %140 = arith.addf %133, %139 : vector<1x4xf32>
        %c0_50 = arith.constant 0 : index
        %c0_51 = arith.constant 0 : index
        %141 = vector.load %arg6[%c0_50, %c0_51] : memref<1x4xf32, #tpu.memory_space<vmem>>, vector<1x4xf32>
        tpu.vector_store %arg6[%c0_50, %c0_51], %140 {strides = array<i32>} : memref<1x4xf32, #tpu.memory_space<vmem>>, vector<1x4xf32>,
      } else {
      }
    } else {
    }
    %c1_i32 = arith.constant 1 : i32
    %3 = arith.cmpi eq, %arg0, %c1_i32 : i32
    %4 = arith.extui %3 : i1 to i32
    %c0_i32_1 = arith.constant 0 : i32
    %5 = arith.cmpi ne, %4, %c0_i32_1 : i32
    scf.if %5 {
      %c0 = arith.constant 0 : index
      %c0_2 = arith.constant 0 : index
      %6 = vector.load %arg6[%c0, %c0_2] : memref<1x4xf32, #tpu.memory_space<vmem>>, vector<1x4xf32>
      %7 = vector.extract_strided_slice %6 {offsets = [0, 0], sizes = [1, 1], strides = [1, 1]} : vector<1x4xf32> to vector<1x1xf32>
      %8 = vector.extract_strided_slice %6 {offsets = [0, 1], sizes = [1, 1], strides = [1, 1]} : vector<1x4xf32> to vector<1x1xf32>
      %9 = vector.extract_strided_slice %6 {offsets = [0, 2], sizes = [1, 1], strides = [1, 1]} : vector<1x4xf32> to vector<1x1xf32>
      %c0_3 = arith.constant 0 : index
      %c0_4 = arith.constant 0 : index
      %10 = vector.load %arg2[%c0_3, %c0_4] : memref<8x256xf32, #tpu.memory_space<vmem>>, vector<8x256xf32>
      %11 = vector.broadcast %7 : vector<1x1xf32> to vector<8x256xf32>
      %12 = arith.mulf %10, %11 : vector<8x256xf32>
      %13 = vector.broadcast %9 : vector<1x1xf32> to vector<8x256xf32>
      %14 = arith.addf %12, %13 : vector<8x256xf32>
      %cst = arith.constant 0.000000e+00 : f32
      %cst_5 = arith.constant 2.550000e+02 : f32
      %15 = vector.broadcast %cst : f32 to vector<8x256xf32>
      %16 = arith.maximumf %15, %14 : vector<8x256xf32>
      %17 = vector.broadcast %cst_5 : f32 to vector<8x256xf32>
      %18 = arith.minimumf %17, %16 : vector<8x256xf32>
      %19 = math.roundeven %18 : vector<8x256xf32>
      %20 = vector.broadcast %9 : vector<1x1xf32> to vector<8x256xf32>
      %21 = arith.subf %19, %20 : vector<8x256xf32>
      %22 = vector.broadcast %8 : vector<1x1xf32> to vector<8x256xf32>
      %23 = arith.mulf %21, %22 : vector<8x256xf32>
      %c0_6 = arith.constant 0 : index
      %c0_7 = arith.constant 0 : index
      %24 = vector.load %arg3[%c0_6, %c0_7] : memref<8x256xf32, #tpu.memory_space<vmem>>, vector<8x256xf32>
      tpu.vector_store %arg3[%c0_6, %c0_7], %23 {strides = array<i32>} : memref<8x256xf32, #tpu.memory_space<vmem>>, vector<8x256xf32>,
    } else {
    }
    return
  }
  func.func @transform_0(%arg0: i32, %arg1: i32) -> (i32, i32) {
    %c1_i32 = arith.constant 1 : i32
    %0 = arith.subi %c1_i32, %arg0 : i32
    %1 = arith.muli %0, %arg1 : i32
    %c0_i32 = arith.constant 0 : i32
    %2 = arith.muli %arg0, %c0_i32 : i32
    %3 = arith.addi %1, %2 : i32
    %c0_i32_0 = arith.constant 0 : i32
    %c0_i32_1 = arith.constant 0 : i32
    return %c0_i32_0, %3 : i32, i32
  }
  func.func @transform_1(%arg0: i32, %arg1: i32) -> (i32, i32) {
    %0 = arith.muli %arg0, %arg1 : i32
    %c0_i32 = arith.constant 0 : i32
    %c0_i32_0 = arith.constant 0 : i32
    return %c0_i32, %0 : i32, i32
  }
  func.func @transform_2(%arg0: i32, %arg1: i32) -> (i32, i32) {
    %c0_i32 = arith.constant 0 : i32
    %c0_i32_0 = arith.constant 0 : i32
    %c0_i32_1 = arith.constant 0 : i32
    return %c0_i32, %c0_i32_0 : i32, i32
  }
}

</mosaic_0001>

<bundles_post_ra>
// kernel: tpu_custom_call.1
= control target key start
LH: loop header
LB: loop body
LE: loop exit
PB: predicated region body
PF: predicated region fallthrough
CT: control target
= control target key end

     0   :  { %8 = vsyncpa [#allocation5], 0  ;;  %s990_s0 = inlined_call_operand.hbm [shape: f32[8,256], index: 0, kind: input, shape index: {}]   ;;  %s991_s1 = inlined_call_operand.hbm [shape: f32[8,256], index: 1, kind: output, shape index: {0}]   ;;  %s992_s2 = inlined_call_operand.hbm [shape: f32[1,4], index: 2, kind: output, shape index: {1}]  }
   0x1   :  { %10 = vsyncpa [#allocation5 + $0x1], 0 }
   0x2   :  { %11 = vsyncpa [#allocation6], 0 }
   0x3   :  { %13 = vsyncpa [#allocation6 + $0x1], 0 }
   0x4   :  { %14 = vsyncpa [#allocation9], 0  ;;  %s833_s9 = smov 0   ;;  %s835_s10 = smov 0  }
   0x5   :  { %s837_s11 = smov 0  }
   0x6 LB: > { %s594_s12 = sadd.s32 4294967295, %s804_s11   ;;  %s595_s13 = sadd.s32 4294967294, %s804_s11   ;;  %s804_s11 = sphi %s837_s11, %s20_s11   ;;  %s800_s10 = sphi %s835_s10, %s998_s10   ;;  %s796_s9 = sphi %s833_s9, %s997_s9  }
   0x7   : > { %s32_s14 = sadd.s32 1, %s800_s10  ;;  %p632_p2 = scmp.lt.s32.totalorder %s804_s11, 2 }
   0x8   : > { %p34_p1 = scmp.ge.s32.totalorder %s32_s14, 2  ;;  %p633_p3 = scmp.eq.s32.totalorder %s804_s11, 0 }
   0x9   : > { %s806_s16 = smov [#allocation4]   ;;  %s690_s20 = scalar_lea.hbm %s990_s0, 256 }
   0xa   : > { %s1000_s14 = smov (%p34_p1, %s32_s14), 0  ;;  %p856_p4 = pnand %p633_p3, %p632_p2 }
   0xb   : > { %s143_s17 = sshll.u32 %s806_s16, 4  ;;  %p691_p6 = scmp.ne.s32.totalorder %s990_s0, %s690_s20  ;;  %s144_s17 = int_to_ptr.vmem [resolvable:$true] %s143_s17 }
   0xc   : > { %p692_p7 = pneg %p856_p4  ;;  %p697_p10 = scmp.lt.u32.totalorder %s690_s20, %s990_s0 }
   0xe   : > { %p693_p8 = pnand %p692_p7, %p691_p6 }
  0x10   : > { %p694_p9 = pneg %p693_p8 }
  0x12   : > { %p699_p11 = pnand %p697_p10, %p694_p9 }
  0x14   : > { %702 = shalt.err (!%p699_p11)
}
  0x15   : > { %s703_s25 = scalar_lea.vmem %s144_s17, 256  ;;  %s710_s26 = scalar_lea.vmem %s144_s17, 512 }
  0x16   : > { %p704_p12 = scmp.ne.s32.totalorder %s144_s17, %s703_s25  ;;  %p711_p2 = scmp.lt.s32.totalorder %s144_s17, %s144_s17 }
  0x17   : > { %p712_p3 = scmp.lt.s32.totalorder %s710_s26, %s703_s25 }
  0x18   : > { %p706_p13 = pnand %p704_p12, %p692_p7 }
  0x19   : > { %p713_p0 = por %p712_p3, %p711_p2 }
  0x1a   : > { %p707_p1 = pneg %p706_p13 }
  0x1c   : > { %p714_p5 = pnand %p713_p0, %p707_p1 }
  0x1e   : > { %717 = shalt.err (!%p714_p5)
}
  0x1f   : > { %627 = dma.hbm_to_vmem [thread:$0]  (!%p856_p4), %s990_s0, 256, %s144_s17, [#allocation5]  }
  0x20   : > { %p148_p6 = scmp.lt.s32.totalorder %s804_s11, 3  ;;  %p994_p8 = scmp.ge.s32.totalorder %s804_s11, 1 }
  0x22   : > { %p149_p9 = pnand %p994_p8, %p148_p6 }
  0x23   : > { %p634_p7 = scmp.eq.s32.totalorder (!%p149_p9), %s594_s12, 0 }
  0x24   : > { %152 = sbr.rel (%p149_p9) target bundleno = 812 (0x32c), region = 24 }
  0x2b   : > { %783 = dma.done.wait (%p634_p7), [#allocation5], 256  }
  0x2c   : > { %785 = vsyncadd (%p634_p7), [#allocation5], 4294967040  ;;  %p601_p0 = scmp.ne.s32.totalorder %s796_s9, 0 }
  0x2d   : > { %v188_v0 = vld [vmem:[#allocation4] sm:$0xff] (!%p601_p0)  ;;  %v189_v1 = vld [vmem:[#allocation4 + $0x8] sm:$0xff] (!%p601_p0)  ;;  %v807_v8 = vmov (!%p601_p0), 1   ;;  %v212_v9 = vlaneseq (!%p601_p0)  ;;  %vm225_vm4 = vcmask (!%p601_p0), 31744   ;;  %vm294_vm5 = vcmask (!%p601_p0), 3072   ;;  %s809_s29 = smov (!%p601_p0), 1  }
  0x2e   : > { %187 = sbr.rel (%p601_p0) target bundleno = 613 (0x265), region = 32  ;;  %v196_v2 = vadd.f32 (!%p601_p0), %v189_v1, %v188_v0  ;;  %v193_v3 = vmax.f32 (!%p601_p0), %v188_v0, %v189_v1  ;;  %v200_v4 = vmul.f32 (!%p601_p0), %v188_v0, %v188_v0  ;;  %v201_v5 = vmul.f32 (!%p601_p0), %v189_v1, %v189_v1  ;;  %677 = vset.pattern.permute.xlu0 (!%p601_p0), %v807_v8  ;;  %s810_s30 = smov (!%p601_p0), 127  }
  0x2f   : > { %v190_v7 = vmin.f32 (!%p601_p0), %v188_v0, %v189_v1  ;;  %v884_v10 = vand.u32 (!%p601_p0), 127, %v212_v9  ;;  %vm302_vm6 = vcmask (!%p601_p0), 7172   ;;  %vm310_vm7 = vcmask (!%p601_p0), 11272  }
  0x30   : > { %197 = vadd.xlane.f32.xlu0 (!%p601_p0), %v196_v2  ;;  %194 = vmax.xlane.f32.xlu1 (!%p601_p0), %v193_v3  ;;  %v202_v6 = vadd.f32 (!%p601_p0), %v201_v5, %v200_v4  ;;  %vm318_vm8 = vcmask (!%p601_p0), 15372   ;;  %v808_v58 = vmov (!%p601_p0), 0   ;;  %vm330_vm9 = vcmask (!%p601_p0), 23568  }
  0x31   : > { %vm216_vm0 = vcmp.eq.s32.totalorder (!%p601_p0), %v884_v10, 1  ;;  %vm214_vm1 = vcmp.eq.s32.totalorder (!%p601_p0), %v884_v10, 0  ;;  %vm219_vm2 = vcmp.eq.s32.totalorder (!%p601_p0), %v884_v10, 2  ;;  %vm222_vm3 = vcmp.eq.s32.totalorder (!%p601_p0), %v884_v10, 3  ;;  %676 = vset.pattern.permute.xlu1 (!%p601_p0), %v808_v58 }
  0x32   : > { %vm341_vm10 = vcmask (!%p601_p0), 31768   ;;  %vm396_vm11 = vcmask (!%p601_p0), 24576  }
  0x34   : > { %203 = vadd.xlane.f32.xlu1 (!%p601_p0), %v202_v6  ;;  %191 = vmin.xlane.f32.xlu0 (!%p601_p0), %v190_v7 }
  0xbd   : > { %v198_v11 = vpop.xlane.xlu0 %197  ;;  %v195_v12 = vpop.xlane.xlu1 %194 }
  0xbe   : > { %v199_v13 = vmul.f32 0.00390625, %v198_v11  ;;  %v217_v17 = vsel %vm216_vm0, %v195_v12, 0.0 }
  0xc0   : > { %v205_v14 = vmul.f32 %v199_v13, %v198_v11  ;;  %v220_v21 = vsel %vm219_vm2, %v199_v13, 0.0 }
  0xc1   : > { %v204_v15 = vpop.xlane.xlu1 %203  ;;  %v192_v16 = vpop.xlane.xlu0 %191 }
  0xc2   : > { %v206_v18 = vsub.f32 %v204_v15, %v205_v14  ;;  %v215_v19 = vsel %vm214_vm1, %v192_v16, 0.0 }
  0xc3   : > { %v218_v20 = vadd.f32 %v217_v17, %v215_v19 }
  0xc4   : > { %v207_v22 = vmax.f32 %v206_v18, 0.0 }
  0xc5   : > { %v221_v23 = vadd.f32 %v220_v21, %v218_v20  ;;  %v811_v20 = vmov 2  }
  0xc6   : > { %v223_v24 = vsel %vm222_vm3, %v207_v22, 0.0  ;;  %v812_v22 = vmov 3  }
  0xc7   : > { %v224_v25 = vadd.f32 %v223_v24, %v221_v23 }
  0xc9   : > { %226 = vst.msk [vmem:[#allocation2] sm:$0xff] %vm225_vm4, %v224_v25 }
  0xd0   : > { %v898_v26 = vld [vmem:[#allocation2] sm:$0xff] }
  0xd1   : > { %v295_v27 = vsel %vm294_vm5, %v898_v26, inf  ;;  %v303_v28 = vsel %vm302_vm6, %v898_v26, inf  ;;  %v311_v29 = vsel %vm310_vm7, %v898_v26, -inf  ;;  %v319_v30 = vsel %vm318_vm8, %v898_v26, -inf }
  0xd2   : > { %v296_v31 = vrot.slane %v295_v27, 4  ;;  %v304_v32 = vrot.slane %v303_v28, 4  ;;  %v312_v33 = vrot.slane %v311_v29, 4  ;;  %v320_v34 = vrot.slane %v319_v30, 4 }
  0xd3   : > { %v331_v60 = vsel %vm330_vm9, %v898_v26, 0.0  ;;  %v342_v23 = vsel %vm341_vm10, %v898_v26, 0.0 }
  0xd4   : > { %v297_v35 = vmin.f32 %v295_v27, %v296_v31  ;;  %v305_v36 = vmin.f32 %v303_v28, %v304_v32  ;;  %v313_v37 = vmax.f32 %v311_v29, %v312_v33  ;;  %v321_v38 = vmax.f32 %v319_v30, %v320_v34 }
  0xd5   : > { %v332_v61 = vrot.slane %v331_v60, 4  ;;  %v343_v24 = vrot.slane %v342_v23, 4 }
  0xd6   : > { %v298_v39 = vrot.slane %v297_v35, 2  ;;  %v306_v40 = vrot.slane %v305_v36, 2  ;;  %v314_v41 = vrot.slane %v313_v37, 2  ;;  %v322_v42 = vrot.slane %v321_v38, 2 }
  0xd7   : > { %v333_v62 = vadd.f32 %v332_v61, %v331_v60  ;;  %v344_v25 = vadd.f32 %v343_v24, %v342_v23 }
  0xd8   : > { %v299_v43 = vmin.f32 %v297_v35, %v298_v39  ;;  %v307_v44 = vmin.f32 %v305_v36, %v306_v40  ;;  %v315_v45 = vmax.f32 %v313_v37, %v314_v41  ;;  %v323_v46 = vmax.f32 %v321_v38, %v322_v42 }
  0xd9   : > { %v334_v63 = vrot.slane %v333_v62, 2  ;;  %v345_v27 = vrot.slane %v344_v25, 2 }
  0xda   : > { %v300_v47 = vrot.slane %v299_v43, 1  ;;  %v308_v48 = vrot.slane %v307_v44, 1  ;;  %v316_v49 = vrot.slane %v315_v45, 1  ;;  %v324_v50 = vrot.slane %v323_v46, 1 }
  0xdb   : > { %v335_v0 = vadd.f32 %v334_v63, %v333_v62  ;;  %v346_v28 = vadd.f32 %v345_v27, %v344_v25 }
  0xdc   : > { %v301_v51 = vmin.f32 %v299_v43, %v300_v47  ;;  %v309_v52 = vmin.f32 %v307_v44, %v308_v48  ;;  %v317_v53 = vmax.f32 %v315_v45, %v316_v49  ;;  %v325_v54 = vmax.f32 %v323_v46, %v324_v50 }
  0xdd   : > { %v336_v1 = vrot.slane %v335_v0, 1  ;;  %v347_v29 = vrot.slane %v346_v28, 1 }
  0xde   : > { %v326_v55 = vadd.f32 %v309_v52, %v301_v51  ;;  %v328_v57 = vadd.f32 %v325_v54, %v317_v53 }
  0xdf   : > { %v337_v2 = vadd.f32 %v336_v1, %v335_v0  ;;  %v348_v31 = vadd.f32 %v347_v29, %v346_v28 }
  0xe0   : > { %v327_v56 = vmul.f32 0.5, %v326_v55  ;;  %v329_v59 = vmul.f32 0.5, %v328_v57 }
  0xe1   : > { %v339_v3 = vmul.f32 0.125, %v337_v2 }
  0xe2   : > { %398 = vrot.lane.b32.xlu0 %v327_v56, %s809_s29  ;;  %v405_v34 = vsub.f32 0.0, %v327_v56 }
  0xe3   : > { %v340_v4 = vsub.f32 %v898_v26, %v339_v3 }
  0xe5   : > { %v349_v5 = vmul.f32 %v340_v4, %v340_v4 }
  0xe6   : > { %375 = vperm.xlu0 %677, %v329_v59  }
  0xe7   : > { %v350_v6 = vsel %vm330_vm9, %v349_v5, 0.0 }
  0xe8   : > { %v351_v7 = vrot.slane %v350_v6, 4 }
  0xea   : > { %v352_v9 = vadd.f32 %v351_v7, %v350_v6 }
  0xec   : > { %v353_v11 = vrot.slane %v352_v9, 2 }
  0xee   : > { %v354_v12 = vadd.f32 %v353_v11, %v352_v9 }
  0xf0   : > { %v355_v15 = vrot.slane %v354_v12, 1 }
  0xf2   : > { %v356_v18 = vadd.f32 %v355_v15, %v354_v12 }
  0xf4   : > { %v357_v19 = vmul.f32 256.0, %v356_v18 }
 0x154   : > { %v399_v13 = vpop.permute.xlu0 %398 }
 0x155   : > { %v401_v14 = vsub.f32 %v329_v59, %v399_v13 }
 0x157   : > { %v403_v16 = vmul.f32 0.003921569, %v401_v14 }
 0x159   : > { %v404_v17 = vmax.f32 %v403_v16, 1e-08 }
 0x15b   : > { %424 = vperm.xlu0 %677, %v404_v17   ;;  %407 = vrot.lane.b32.xlu1 %v404_v17, %s810_s30  ;;  %682 = vrcp.f32 %v404_v17 }
 0x15f   : > { %359 = vrot.lane.b32.xlu1 %v357_v19, %s809_s29  ;;  %681 = vset.pattern.permute.xlu0 %v808_v58 }
 0x163   : > { %368 = vperm.xlu1 %676, %v327_v56  }
 0x165   : > { %v683_v21 = vpop.eup %682  ;;  %v376_v40 = vpop.permute.xlu0 %375 }
 0x166   : > { %v378_v43 = vsel %vm216_vm0, %v376_v40, 0.0 }
 0x167   : > { %678 = vset.pattern.permute.xlu1 %v811_v20 }
 0x168   : > { %383 = vperm.xlu1 %678, %v339_v3  }
 0x16c   : > { %679 = vset.pattern.permute.xlu1 %v807_v8 }
 0x16d   : > { %419 = vperm.xlu1 %679, %v683_v21  }
 0x171   : > { %680 = vset.pattern.permute.xlu1 %v812_v22 }
 0x1cd   : > { %v408_v30 = vpop.permute.xlu1 %407 }
 0x1ce   : > { %684 = vrcp.f32 %v408_v30 }
 0x1d1   : > { %v360_v32 = vpop.permute.xlu1 %359 }
 0x1d2   : > { %v362_v33 = vadd.f32 %v360_v32, %v348_v31 }
 0x1d4   : > { %391 = vperm.xlu1 %680, %v362_v33  }
 0x1d8   : > { %v685_v35 = vpop.eup %684 }
 0x1d9   : > { %v411_v8 = vmul.f32 %v685_v35, %v405_v34 }
 0x1da   : > { %v425_v50 = vpop.permute.xlu0 %424 }
 0x1db   : > { %v412_v36 = vmax.f32 %v411_v8, 0.0  ;;  %v427_v52 = vsel %vm216_vm0, %v425_v50, 0.0 }
 0x1dd   : > { %v413_v37 = vmin.f32 %v412_v36, 255.0 }
 0x1df   : > { %v414_v38 = vfloor.f32 %v413_v37 }
 0x1e1   : > { %431 = vperm.xlu0 %681, %v414_v38  }
 0x1e2   : > { %v369_v39 = vpop.permute.xlu1 %368 }
 0x1e3   : > { %v371_v41 = vsel %vm214_vm1, %v369_v39, 0.0 }
 0x1e4   : > { %v379_v45 = vadd.f32 %v378_v43, %v371_v41 }
 0x1e7   : > { %v384_v26 = vpop.permute.xlu1 %383 }
 0x1e8   : > { %v386_v44 = vsel %vm219_vm2, %v384_v26, 0.0 }
 0x1e9   : > { %v387_v46 = vadd.f32 %v386_v44, %v379_v45 }
 0x1ec   : > { %v420_v42 = vpop.permute.xlu1 %419 }
 0x1ed   : > { %v422_v51 = vsel %vm214_vm1, %v420_v42, 0.0 }
 0x1ee   : > { %v428_v53 = vadd.f32 %v427_v52, %v422_v51 }
 0x253   : > { %v392_v47 = vpop.permute.xlu1 %391 }
 0x254   : > { %v394_v48 = vsel %vm222_vm3, %v392_v47, 0.0 }
 0x255   : > { %v395_v49 = vadd.f32 %v394_v48, %v387_v46 }
 0x257   : > { %397 = vst.msk [vmem:[#allocation8] sm:$0x1] %vm396_vm11, %v395_v49 }
 0x260   : > { %v432_v54 = vpop.permute.xlu0 %431 }
 0x261   : > { %v434_v55 = vsel %vm219_vm2, %v432_v54, 0.0 }
 0x262   : > { %v435_v56 = vadd.f32 %v434_v55, %v428_v53 }
 0x264   : > { %437 = vst.msk [vmem:[#allocation3] sm:$0x1] %vm396_vm11, %v435_v56 }
 0x265 PF: > { %p602_p4 = scmp.ne.s32.totalorder %s796_s9, 1 }
 0x266   : > { %v813_v58 = vmov (!%p602_p4), 0   ;;  %v814_v59 = vmov (!%p602_p4), 1   ;;  %v815_v60 = vmov (!%p602_p4), 2   ;;  %v443_v10 = vld [vmem:[#allocation4] sm:$0xff] (!%p602_p4)  ;;  %v444_v62 = vld [vmem:[#allocation4 + $0x8] sm:$0xff] (!%p602_p4) }
 0x267   : > { %441 = sbr.rel (%p602_p4) target bundleno = 766 (0x2fe), region = 48  ;;  %686 = vset.pattern.permute.xlu0 (!%p602_p4), %v813_v58  ;;  %688 = vset.pattern.permute.xlu1 (!%p602_p4), %v814_v59 }
 0x26b   : > { %v603_v57 = vld [vmem:[#allocation3] ss:$0 sm:$0xff] (!%p602_p4) }
 0x26c   : > { %451 = vperm.xlu0 (!%p602_p4), %686, %v603_v57   ;;  %471 = vperm.xlu1 (!%p602_p4), %688, %v603_v57  }
 0x270   : > { %687 = vset.pattern.permute.xlu0 %v815_v60 }
 0x271   : > { %457 = vperm.xlu0 %687, %v603_v57  }
 0x275   : > { %689 = vset.pattern.permute.xlu0 %v814_v59 }
 0x2eb   : > { %v452_v61 = vpop.permute.xlu0 %451  ;;  %v472_v12 = vpop.permute.xlu1 %471 }
 0x2ec   : > { %v454_v63 = vmul.f32 %v452_v61, %v443_v10  ;;  %v455_v0 = vmul.f32 %v452_v61, %v444_v62 }
 0x2f0   : > { %v458_v1 = vpop.permute.xlu0 %457 }
 0x2f1   : > { %v460_v2 = vadd.f32 %v458_v1, %v454_v63  ;;  %v461_v3 = vadd.f32 %v458_v1, %v455_v0 }
 0x2f3   : > { %v462_v4 = vmax.f32 %v460_v2, 0.0  ;;  %v463_v5 = vmax.f32 %v461_v3, 0.0 }
 0x2f5   : > { %v464_v6 = vmin.f32 %v462_v4, 255.0  ;;  %v465_v7 = vmin.f32 %v463_v5, 255.0 }
 0x2f7   : > { %v610_v9 = vround.rtne.f32 %v464_v6  ;;  %v611_v11 = vround.rtne.f32 %v465_v7 }
 0x2f9   : > { %v468_v13 = vsub.f32 %v610_v9, %v458_v1  ;;  %v469_v14 = vsub.f32 %v611_v11, %v458_v1 }
 0x2fb   : > { %v474_v15 = vmul.f32 %v472_v12, %v468_v13  ;;  %v475_v16 = vmul.f32 %v472_v12, %v469_v14 }
 0x2fd   : > { %476 = vst [vmem:[#allocation7] sm:$0xff] %v474_v15  ;;  %477 = vst [vmem:[#allocation7 + $0x8] sm:$0xff] %v475_v16 }
 0x2fe PF: > { %p925_p5 = scmp.eq.s32.totalorder %s594_s12, 1  ;;  %s816_s4 = smov [#allocation7]  }
 0x2ff   : > { %s494_s5 = sshll.u32 %s816_s4, 4  ;;  %s817_s6 = smov [#allocation8]   ;;  %s495_s5 = int_to_ptr.vmem [resolvable:$true] %s494_s5 }
 0x300   : > { %s505_s7 = sshll.u32 %s817_s6, 4  ;;  %s718_s8 = scalar_lea.vmem %s495_s5, 256  ;;  %s929_s7 = int_to_ptr.vmem [resolvable:$true] %s505_s7 }
 0x301   : > { %p719_p10 = scmp.ne.s32.totalorder %s495_s5, %s718_s8  ;;  %s724_s9 = scalar_lea.vmem %s495_s5, 512 }
 0x302   : > { %p725_p13 = scmp.lt.s32.totalorder %s495_s5, %s495_s5  ;;  %p726_p1 = scmp.lt.s32.totalorder %s724_s9, %s718_s8 }
 0x303   : > { %p720_p11 = pnand %p719_p10, %p925_p5 }
 0x304   : > { %p727_p2 = por %p726_p1, %p725_p13 }
 0x305   : > { %p721_p12 = pneg %p720_p11 }
 0x307   : > { %p728_p3 = pnand %p727_p2, %p721_p12 }
 0x309   : > { %731 = shalt.err (!%p728_p3)
}
 0x30a   : > { %s732_s16 = scalar_lea.hbm %s991_s1, 256 }
 0x30b   : > { %p733_p6 = scmp.ne.s32.totalorder %s991_s1, %s732_s16  ;;  %p738_p7 = scmp.lt.u32.totalorder %s732_s16, %s991_s1 }
 0x30d   : > { %p734_p8 = pnand %p733_p6, %p925_p5 }
 0x30f   : > { %p735_p9 = pneg %p734_p8 }
 0x311   : > { %p740_p0 = pnand %p738_p7, %p735_p9 }
 0x313   : > { %743 = shalt.err (!%p740_p0)
}
 0x314   : > { %617 = dma.vmem_to_hbm [thread:$0]  (%p925_p5), %s495_s5, 256, %s991_s1, [#allocation6]  }
 0x315   : > { %s744_s23 = scalar_lea.vmem %s929_s7, 16  ;;  %s750_s24 = scalar_lea.vmem %s929_s7, 32 }
 0x316   : > { %p745_p4 = scmp.ne.s32.totalorder %s929_s7, %s744_s23  ;;  %p751_p12 = scmp.lt.s32.totalorder %s929_s7, %s929_s7 }
 0x317   : > { %p752_p13 = scmp.lt.s32.totalorder %s750_s24, %s744_s23 }
 0x318   : > { %p746_p10 = pnand %p745_p4, %p925_p5 }
 0x319   : > { %p753_p1 = por %p752_p13, %p751_p12 }
 0x31a   : > { %p747_p11 = pneg %p746_p10 }
 0x31c   : > { %p754_p2 = pnand %p753_p1, %p747_p11 }
 0x31e   : > { %757 = shalt.err (!%p754_p2)
}
 0x31f   : > { %s758_s27 = scalar_lea.hbm %s992_s2, 16 }
 0x320   : > { %p759_p3 = scmp.ne.s32.totalorder %s992_s2, %s758_s27  ;;  %p764_p9 = scmp.lt.u32.totalorder %s758_s27, %s992_s2 }
 0x322   : > { %p760_p6 = pnand %p759_p3, %p925_p5 }
 0x324   : > { %p761_p8 = pneg %p760_p6 }
 0x326   : > { %p766_p7 = pnand %p764_p9, %p761_p8 }
 0x328   : > { %769 = shalt.err (!%p766_p7)
}
 0x329   : > { %619 = dma.vmem_to_hbm [thread:$0]  (%p925_p5), %s929_s7, 16, %s992_s2, [#allocation9]  }
 0x32a   : > { %787 = dma.done.wait (%p925_p5), [#allocation9], 16  }
 0x32b   : > { %789 = vsyncadd (%p925_p5), [#allocation9], 4294967280 }
 0x32c PF: > { %p639_p0 = scmp.eq.s32.totalorder %s595_s13, 1  ;;  %p996_p4 = scmp.ge.s32.totalorder %s804_s11, 2 }
 0x32e   : > { %p629_p10 = pnand %p639_p0, %p996_p4 }
 0x330   : > { %791 = dma.done.wait (!%p629_p10), [#allocation6], 256  }
 0x331   : > { %793 = vsyncadd (!%p629_p10), [#allocation6], 4294967040  ;;  %s20_s11 = sadd.s32 1, %s804_s11   ;;  %s997_s9 = smov %s800_s10 }
 0x332   : > { %p17_p11 = scmp.ge.s32.totalorder %s20_s11, 4   ;;  %s998_s10 = smov %s1000_s14 }
 0x334   :  { %19 = sbr.rel (!%p17_p11) target bundleno = 6 (0x6), region = 97 }
 0x33b   :  { %527 = vsyncpa [#allocation5], 1 }
 0x33c   :  { %529 = vsyncpa [#allocation5 + $0x1], 1 }
 0x33d   :  { %530 = vsyncpa [#allocation6], 1 }
 0x33e   :  { %532 = vsyncpa [#allocation6 + $0x1], 1 }
 0x33f   :  { %533 = vsyncpa [#allocation9], 1 }

</bundles_post_ra>
